<compile_context>
chip_gen: v6e
topology: v6e:2x2x1
jax: 0.10.0
libtpu: 0.0.40
codegen_flags: <defaults>
</compile_context>

<pallas_src>
import functools

import jax
import jax.numpy as jnp
from jax.experimental import pallas as pl
from jax.experimental.pallas import tpu as pltpu

NEG_SLOPE = 0.01  # nn.LeakyReLU() default


def _round_up(v, m):
    return ((v + m - 1) // m) * m


def _mlp_kernel(num_layers, compute_dtype, *refs):
    """refs = (x_ref, W0_ref, b0_ref, W1_ref, b1_ref, ..., out_ref)."""
    x_ref = refs[0]
    o_ref = refs[-1]
    h = x_ref[...]
    if h.dtype != compute_dtype:
        h = h.astype(compute_dtype)
    for li in range(num_layers):
        w_ref = refs[1 + 2 * li]
        b_ref = refs[2 + 2 * li]
        # MXU matmul (bf16 operands on the fast path) with f32 accumulation;
        # bias add stays in f32.
        acc = jnp.dot(h, w_ref[...], preferred_element_type=jnp.float32) + b_ref[...]
        if li < num_layers - 1:
            # LeakyReLU (VPU elementwise). Dropout == identity in eval mode.
            # TODO(synk): training-mode dropout would need pltpu.prng_* here.
            acc = jnp.where(acc > 0, acc, NEG_SLOPE * acc)
            h = acc.astype(compute_dtype)
        else:
            h = acc
    o_ref[...] = h.astype(o_ref.dtype)


def prepare_params(params, compute_dtype=jnp.bfloat16):
    """One-time pad + cast of (W:(d_in,d_out), b:(1,d_out)) pairs.

    Hidden-layer output dims are padded to multiples of 128 (lane-dense);
    the final layer's output dim is kept exact so the kernel writes only the
    true d_out columns. Input dims are padded to multiples of 128.
    """
    num_layers = len(params)
    d_in = params[0][0].shape[0]
    d_out = params[-1][0].shape[1]
    flat, dims = [], []
    prev_p = _round_up(d_in, 128)
    for li, (W, b) in enumerate(params):
        di, do = W.shape
        last = li == num_layers - 1
        do_p = do if last else _round_up(do, 128)
        W_p = jnp.zeros((prev_p, do_p), compute_dtype).at[:di, :do].set(
            W.astype(compute_dtype))
        b_p = jnp.zeros((1, do_p), jnp.float32).at[:, :do].set(
            b.astype(jnp.float32))
        flat.extend([W_p, b_p])
        dims.append((prev_p, do_p))
        prev_p = do_p
    return {
        "flat": flat,
        "dims": tuple(dims),
        "d_in": d_in,
        "d_in_p": _round_up(d_in, 128),
        "d_out": d_out,
        "num_layers": num_layers,
        "compute_dtype": compute_dtype,
    }


def feedforward_dropout(x, prepped, *, block_b=512):
    """x: (B, d_in) f32; prepped: output of prepare_params()."""
    num_layers = prepped["num_layers"]
    dims = prepped["dims"]
    d_in, d_in_p, d_out = prepped["d_in"], prepped["d_in_p"], prepped["d_out"]
    compute_dtype = prepped["compute_dtype"]
    flat_params = prepped["flat"]

    B = x.shape[0]
    assert x.shape[1] == d_in
    out_dtype = x.dtype
    itemsize = jnp.dtype(compute_dtype).itemsize
    out_itemsize = jnp.dtype(out_dtype).itemsize

    # ---- batch tile selection --------------------------------------------
    align = 16 if itemsize == 2 else 8  # bf16 packs (16,128) per vreg
    TB = _round_up(max(align, min(block_b, B)), align)

    # VMEM budget: single-buffered resident weights + double-buffered x/out
    # tiles + f32 activation working set. Shrink TB until it fits.
    w_resident = sum(dip * dop * itemsize + dop * 4 for (dip, dop) in dims)
    max_dop = max(dop for (_, dop) in dims)

    def needed_bytes(tb):
        return (w_resident
                + 2 * tb * d_in_p * itemsize       # x tile (double-buffered)
                + 2 * tb * d_out * out_itemsize    # out tile (double-buffered)
                + 2 * tb * max_dop * 4)            # f32 acc / activations

    budget = 56 * 2 ** 20  # headroom under v7x's 64 MiB per-TC VMEM
    while needed_bytes(TB) > budget and TB > align:
        TB = max(align, _round_up(TB // 2, align))

    # Keep >= 2 grid steps so the "parallel" axis can shard over both
    # TensorCores on v7x (and pipeline x/out DMAs with compute).
    if B <= TB and B > align:
        TB = _round_up(-(-B // 2), align)

    Bp = _round_up(B, TB)
    grid = (Bp // TB,)

    # ---- x padding only when actually needed -------------------------------
    if Bp != B or d_in_p != d_in:
        x_in = jnp.zeros((Bp, d_in_p), compute_dtype).at[:B, :d_in].set(
            x.astype(compute_dtype))
    else:
        x_in = x.astype(compute_dtype)  # no-op if dtypes already match

    # ---- scheduler hints ----------------------------------------------------
    flops = 2 * Bp * sum(dip * dop for (dip, dop) in dims)
    bytes_accessed = (Bp * d_in_p * itemsize
                      + Bp * d_out * out_itemsize
                      + sum(dip * dop * itemsize + dop * 4 for (dip, dop) in dims))
    cost = pl.CostEstimate(flops=flops, transcendentals=0,
                           bytes_accessed=bytes_accessed)
    vmem_limit = int(min(64 * 2 ** 20,
                         max(needed_bytes(TB) + (8 << 20), 32 << 20)))

    kernel = functools.partial(_mlp_kernel, num_layers, compute_dtype)

    def _call(single_buffer_weights):
        param_mode = {}
        if single_buffer_weights:
            # Weights/biases are grid-invariant: one VMEM copy is enough.
            param_mode = dict(pipeline_mode=pl.Buffered(1))
        in_specs = [pl.BlockSpec((TB, d_in_p), lambda i: (i, 0))]
        for (dip, dop) in dims:
            in_specs.append(pl.BlockSpec((dip, dop), lambda i: (0, 0), **param_mode))
            in_specs.append(pl.BlockSpec((1, dop), lambda i: (0, 0), **param_mode))
        out_spec = pl.BlockSpec((TB, d_out), lambda i: (i, 0))
        return pl.pallas_call(
            kernel,
            out_shape=jax.ShapeDtypeStruct((Bp, d_out), out_dtype),
            grid=grid,
            in_specs=in_specs,
            out_specs=out_spec,
            compiler_params=pltpu.CompilerParams(
                dimension_semantics=("parallel",),
                vmem_limit_bytes=vmem_limit),
            cost_estimate=cost,
        )(x_in, *flat_params)

    try:
        out_p = _call(True)
    except Exception:
        # Fallback if single-buffered (pipeline_mode=Buffered(1)) specs are not
        # supported by this jax version.
        out_p = _call(False)

    return out_p[:B] if Bp != B else out_p


def init_params(structure, key):
    """Deterministic init mimicking nn.Linear's uniform(-1/sqrt(in), 1/sqrt(in))."""
    params = []
    for i in range(len(structure) - 1):
        d_in, d_out = structure[i], structure[i + 1]
        key, kw, kb = jax.random.split(key, 3)
        bound = 1.0 / jnp.sqrt(jnp.float32(d_in))
        W = jax.random.uniform(kw, (d_in, d_out), jnp.float32, -bound, bound)
        b = jax.random.uniform(kb, (1, d_out), jnp.float32, -bound, bound)
        params.append((W, b))
    return params


def reference(x, params):
    h = x
    n = len(params)
    for i, (W, b) in enumerate(params):
        h = h @ W + b
        if i < n - 1:
            h = jnp.where(h > 0, h, NEG_SLOPE * h)
    return h


if __name__ == "__main__":
    # structure = [in, hidden, hidden, out] => 2 (Linear+LeakyReLU+Dropout)
    # blocks followed by a final Linear.
    structure = [32, 64, 48, 16]
    batch = 100  # deliberately not tile-aligned: exercises the padding path

    key = jax.random.PRNGKey(0)
    key, kx = jax.random.split(key)
    x = jax.random.normal(kx, (batch, structure[0]), jnp.float32)
    params = init_params(structure, key)
    ref = reference(x, params)

    # Fast path: bf16 MXU operands, f32 accumulation (looser tolerance).
    prepped_bf16 = prepare_params(params, compute_dtype=jnp.bfloat16)
    out = feedforward_dropout(x, prepped_bf16)
    out = jax.block_until_ready(out)
    assert out.shape == (batch, structure[-1])
    assert jnp.allclose(out, ref, atol=3e-2, rtol=3e-2), "bf16 path mismatch"

    # Debug/reference path: f32 operands (slower on v5e/v6e MXUs; exact check).
    prepped_f32 = prepare_params(params, compute_dtype=jnp.float32)
    out_f32 = jax.block_until_ready(feedforward_dropout(x, prepped_f32))
    assert jnp.allclose(out_f32, ref, atol=1e-5, rtol=1e-5), "f32 path mismatch"

    print("KERNEL_OK")
</pallas_src>

<mosaic_0001>
module attributes {stable_mosaic.version = 11 : i64} {
  func.func @_mlp_kernel(%arg0: i32, %arg1: memref<64x128xbf16, #tpu.memory_space<vmem>>, %arg2: memref<128x128xbf16, #tpu.memory_space<vmem>>, %arg3: memref<1x128xf32, #tpu.memory_space<vmem>>, %arg4: memref<128x128xbf16, #tpu.memory_space<vmem>>, %arg5: memref<1x128xf32, #tpu.memory_space<vmem>>, %arg6: memref<128x16xbf16, #tpu.memory_space<vmem>>, %arg7: memref<1x16xf32, #tpu.memory_space<vmem>>, %arg8: memref<64x16xf32, #tpu.memory_space<vmem>>) attributes {dimension_semantics = [#tpu.dimension_semantics<parallel>], iteration_bounds = array<i64: 2>, scalar_prefetch = 0 : i64, scratch_operands = 0 : i64, tpu.core_type = #tpu.core_type<tc>, window_params = [{transform_indices = @transform_0, window_bounds = array<i64: 64, 128>}, {pipeline_mode = #tpu.pipeline_mode<synchronous>, transform_indices = @transform_1, window_bounds = array<i64: 128, 128>}, {pipeline_mode = #tpu.pipeline_mode<synchronous>, transform_indices = @transform_2, window_bounds = array<i64: 1, 128>}, {pipeline_mode = #tpu.pipeline_mode<synchronous>, transform_indices = @transform_3, window_bounds = array<i64: 128, 128>}, {pipeline_mode = #tpu.pipeline_mode<synchronous>, transform_indices = @transform_4, window_bounds = array<i64: 1, 128>}, {pipeline_mode = #tpu.pipeline_mode<synchronous>, transform_indices = @transform_5, window_bounds = array<i64: 128, 16>}, {pipeline_mode = #tpu.pipeline_mode<synchronous>, transform_indices = @transform_6, window_bounds = array<i64: 1, 16>}, {transform_indices = @transform_7, window_bounds = array<i64: 64, 16>}]} {
    %c0 = arith.constant 0 : index
    %c0_0 = arith.constant 0 : index
    %0 = vector.load %arg1[%c0, %c0_0] : memref<64x128xbf16, #tpu.memory_space<vmem>>, vector<64x128xbf16>
    %c0_1 = arith.constant 0 : index
    %c0_2 = arith.constant 0 : index
    %1 = vector.load %arg2[%c0_1, %c0_2] : memref<128x128xbf16, #tpu.memory_space<vmem>>, vector<128x128xbf16>
    %cst = arith.constant dense<0.000000e+00> : vector<64x128xf32>
    %2 = tpu.matmul %0, %1, %cst {dimension_numbers = #tpu.dot_dimension_numbers<[1], [0], [0], [1], [0, 0, 1, 1], [], []>} : vector<64x128xbf16>, vector<128x128xbf16>, vector<64x128xf32> -> vector<64x128xf32>
    %c0_3 = arith.constant 0 : index
    %c0_4 = arith.constant 0 : index
    %3 = vector.load %arg3[%c0_3, %c0_4] : memref<1x128xf32, #tpu.memory_space<vmem>>, vector<1x128xf32>
    %4 = vector.broadcast %3 : vector<1x128xf32> to vector<64x128xf32>
    %5 = arith.addf %2, %4 : vector<64x128xf32>
    %cst_5 = arith.constant 0.000000e+00 : f32
    %6 = vector.broadcast %cst_5 : f32 to vector<64x128xf32>
    %7 = arith.cmpf ogt, %5, %6 : vector<64x128xf32>
    %cst_6 = arith.constant 0.00999999977 : f32
    %8 = vector.broadcast %cst_6 : f32 to vector<64x128xf32>
    %9 = arith.mulf %8, %5 : vector<64x128xf32>
    %10 = arith.select %7, %5, %9 : vector<64x128xi1>, vector<64x128xf32>
    %11 = arith.truncf %10 : vector<64x128xf32> to vector<64x128xbf16>
    %c0_7 = arith.constant 0 : index
    %c0_8 = arith.constant 0 : index
    %12 = vector.load %arg4[%c0_7, %c0_8] : memref<128x128xbf16, #tpu.memory_space<vmem>>, vector<128x128xbf16>
    %cst_9 = arith.constant dense<0.000000e+00> : vector<64x128xf32>
    %13 = tpu.matmul %11, %12, %cst_9 {dimension_numbers = #tpu.dot_dimension_numbers<[1], [0], [0], [1], [0, 0, 1, 1], [], []>} : vector<64x128xbf16>, vector<128x128xbf16>, vector<64x128xf32> -> vector<64x128xf32>
    %c0_10 = arith.constant 0 : index
    %c0_11 = arith.constant 0 : index
    %14 = vector.load %arg5[%c0_10, %c0_11] : memref<1x128xf32, #tpu.memory_space<vmem>>, vector<1x128xf32>
    %15 = vector.broadcast %14 : vector<1x128xf32> to vector<64x128xf32>
    %16 = arith.addf %13, %15 : vector<64x128xf32>
    %cst_12 = arith.constant 0.000000e+00 : f32
    %17 = vector.broadcast %cst_12 : f32 to vector<64x128xf32>
    %18 = arith.cmpf ogt, %16, %17 : vector<64x128xf32>
    %cst_13 = arith.constant 0.00999999977 : f32
    %19 = vector.broadcast %cst_13 : f32 to vector<64x128xf32>
    %20 = arith.mulf %19, %16 : vector<64x128xf32>
    %21 = arith.select %18, %16, %20 : vector<64x128xi1>, vector<64x128xf32>
    %22 = arith.truncf %21 : vector<64x128xf32> to vector<64x128xbf16>
    %c0_14 = arith.constant 0 : index
    %c0_15 = arith.constant 0 : index
    %23 = vector.load %arg6[%c0_14, %c0_15] : memref<128x16xbf16, #tpu.memory_space<vmem>>, vector<128x16xbf16>
    %cst_16 = arith.constant dense<0.000000e+00> : vector<64x16xf32>
    %24 = tpu.matmul %22, %23, %cst_16 {dimension_numbers = #tpu.dot_dimension_numbers<[1], [0], [0], [1], [0, 0, 1, 1], [], []>} : vector<64x128xbf16>, vector<128x16xbf16>, vector<64x16xf32> -> vector<64x16xf32>
    %c0_17 = arith.constant 0 : index
    %c0_18 = arith.constant 0 : index
    %25 = vector.load %arg7[%c0_17, %c0_18] : memref<1x16xf32, #tpu.memory_space<vmem>>, vector<1x16xf32>
    %26 = vector.broadcast %25 : vector<1x16xf32> to vector<64x16xf32>
    %27 = arith.addf %24, %26 : vector<64x16xf32>
    %c0_19 = arith.constant 0 : index
    %c0_20 = arith.constant 0 : index
    %28 = vector.load %arg8[%c0_19, %c0_20] : memref<64x16xf32, #tpu.memory_space<vmem>>, vector<64x16xf32>
    tpu.vector_store %arg8[%c0_19, %c0_20], %27 {strides = array<i32>} : memref<64x16xf32, #tpu.memory_space<vmem>>, vector<64x16xf32>,
    return
  }
  func.func @transform_0(%arg0: i32) -> (i32, i32) {
    %c0_i32 = arith.constant 0 : i32
    %c0_i32_0 = arith.constant 0 : i32
    return %arg0, %c0_i32 : i32, i32
  }
  func.func @transform_1(%arg0: i32) -> (i32, i32) {
    %c0_i32 = arith.constant 0 : i32
    %c0_i32_0 = arith.constant 0 : i32
    %c0_i32_1 = arith.constant 0 : i32
    return %c0_i32, %c0_i32_0 : i32, i32
  }
  func.func @transform_2(%arg0: i32) -> (i32, i32) {
    %c0_i32 = arith.constant 0 : i32
    %c0_i32_0 = arith.constant 0 : i32
    %c0_i32_1 = arith.constant 0 : i32
    return %c0_i32, %c0_i32_0 : i32, i32
  }
  func.func @transform_3(%arg0: i32) -> (i32, i32) {
    %c0_i32 = arith.constant 0 : i32
    %c0_i32_0 = arith.constant 0 : i32
    %c0_i32_1 = arith.constant 0 : i32
    return %c0_i32, %c0_i32_0 : i32, i32
  }
  func.func @transform_4(%arg0: i32) -> (i32, i32) {
    %c0_i32 = arith.constant 0 : i32
    %c0_i32_0 = arith.constant 0 : i32
    %c0_i32_1 = arith.constant 0 : i32
    return %c0_i32, %c0_i32_0 : i32, i32
  }
  func.func @transform_5(%arg0: i32) -> (i32, i32) {
    %c0_i32 = arith.constant 0 : i32
    %c0_i32_0 = arith.constant 0 : i32
    %c0_i32_1 = arith.constant 0 : i32
    return %c0_i32, %c0_i32_0 : i32, i32
  }
  func.func @transform_6(%arg0: i32) -> (i32, i32) {
    %c0_i32 = arith.constant 0 : i32
    %c0_i32_0 = arith.constant 0 : i32
    %c0_i32_1 = arith.constant 0 : i32
    return %c0_i32, %c0_i32_0 : i32, i32
  }
  func.func @transform_7(%arg0: i32) -> (i32, i32) {
    %c0_i32 = arith.constant 0 : i32
    %c0_i32_0 = arith.constant 0 : i32
    return %arg0, %c0_i32 : i32, i32
  }
}

module attributes {stable_mosaic.version = 11 : i64} {
  func.func @_mlp_kernel(%arg0: i32, %arg1: memref<64x128xbf16, #tpu.memory_space<vmem>>, %arg2: memref<128x128xbf16, #tpu.memory_space<vmem>>, %arg3: memref<1x128xf32, #tpu.memory_space<vmem>>, %arg4: memref<128x128xbf16, #tpu.memory_space<vmem>>, %arg5: memref<1x128xf32, #tpu.memory_space<vmem>>, %arg6: memref<128x16xbf16, #tpu.memory_space<vmem>>, %arg7: memref<1x16xf32, #tpu.memory_space<vmem>>, %arg8: memref<64x16xf32, #tpu.memory_space<vmem>>) attributes {dimension_semantics = [#tpu.dimension_semantics<parallel>], iteration_bounds = array<i64: 2>, scalar_prefetch = 0 : i64, scratch_operands = 0 : i64, tpu.core_type = #tpu.core_type<tc>, window_params = [{transform_indices = @transform_0, window_bounds = array<i64: 64, 128>}, {pipeline_mode = #tpu.pipeline_mode<synchronous>, transform_indices = @transform_1, window_bounds = array<i64: 128, 128>}, {pipeline_mode = #tpu.pipeline_mode<synchronous>, transform_indices = @transform_2, window_bounds = array<i64: 1, 128>}, {pipeline_mode = #tpu.pipeline_mode<synchronous>, transform_indices = @transform_3, window_bounds = array<i64: 128, 128>}, {pipeline_mode = #tpu.pipeline_mode<synchronous>, transform_indices = @transform_4, window_bounds = array<i64: 1, 128>}, {pipeline_mode = #tpu.pipeline_mode<synchronous>, transform_indices = @transform_5, window_bounds = array<i64: 128, 16>}, {pipeline_mode = #tpu.pipeline_mode<synchronous>, transform_indices = @transform_6, window_bounds = array<i64: 1, 16>}, {transform_indices = @transform_7, window_bounds = array<i64: 64, 16>}]} {
    %c0 = arith.constant 0 : index
    %c0_0 = arith.constant 0 : index
    %0 = vector.load %arg1[%c0, %c0_0] : memref<64x128xbf16, #tpu.memory_space<vmem>>, vector<64x128xbf16>
    %c0_1 = arith.constant 0 : index
    %c0_2 = arith.constant 0 : index
    %1 = vector.load %arg2[%c0_1, %c0_2] : memref<128x128xbf16, #tpu.memory_space<vmem>>, vector<128x128xbf16>
    %cst = arith.constant dense<0.000000e+00> : vector<64x128xf32>
    %2 = tpu.matmul %0, %1, %cst {dimension_numbers = #tpu.dot_dimension_numbers<[1], [0], [0], [1], [0, 0, 1, 1], [], []>} : vector<64x128xbf16>, vector<128x128xbf16>, vector<64x128xf32> -> vector<64x128xf32>
    %c0_3 = arith.constant 0 : index
    %c0_4 = arith.constant 0 : index
    %3 = vector.load %arg3[%c0_3, %c0_4] : memref<1x128xf32, #tpu.memory_space<vmem>>, vector<1x128xf32>
    %4 = vector.broadcast %3 : vector<1x128xf32> to vector<64x128xf32>
    %5 = arith.addf %2, %4 : vector<64x128xf32>
    %cst_5 = arith.constant 0.000000e+00 : f32
    %6 = vector.broadcast %cst_5 : f32 to vector<64x128xf32>
    %7 = arith.cmpf ogt, %5, %6 : vector<64x128xf32>
    %cst_6 = arith.constant 0.00999999977 : f32
    %8 = vector.broadcast %cst_6 : f32 to vector<64x128xf32>
    %9 = arith.mulf %8, %5 : vector<64x128xf32>
    %10 = arith.select %7, %5, %9 : vector<64x128xi1>, vector<64x128xf32>
    %11 = arith.truncf %10 : vector<64x128xf32> to vector<64x128xbf16>
    %c0_7 = arith.constant 0 : index
    %c0_8 = arith.constant 0 : index
    %12 = vector.load %arg4[%c0_7, %c0_8] : memref<128x128xbf16, #tpu.memory_space<vmem>>, vector<128x128xbf16>
    %cst_9 = arith.constant dense<0.000000e+00> : vector<64x128xf32>
    %13 = tpu.matmul %11, %12, %cst_9 {dimension_numbers = #tpu.dot_dimension_numbers<[1], [0], [0], [1], [0, 0, 1, 1], [], []>} : vector<64x128xbf16>, vector<128x128xbf16>, vector<64x128xf32> -> vector<64x128xf32>
    %c0_10 = arith.constant 0 : index
    %c0_11 = arith.constant 0 : index
    %14 = vector.load %arg5[%c0_10, %c0_11] : memref<1x128xf32, #tpu.memory_space<vmem>>, vector<1x128xf32>
    %15 = vector.broadcast %14 : vector<1x128xf32> to vector<64x128xf32>
    %16 = arith.addf %13, %15 : vector<64x128xf32>
    %cst_12 = arith.constant 0.000000e+00 : f32
    %17 = vector.broadcast %cst_12 : f32 to vector<64x128xf32>
    %18 = arith.cmpf ogt, %16, %17 : vector<64x128xf32>
    %cst_13 = arith.constant 0.00999999977 : f32
    %19 = vector.broadcast %cst_13 : f32 to vector<64x128xf32>
    %20 = arith.mulf %19, %16 : vector<64x128xf32>
    %21 = arith.select %18, %16, %20 : vector<64x128xi1>, vector<64x128xf32>
    %22 = arith.truncf %21 : vector<64x128xf32> to vector<64x128xbf16>
    %c0_14 = arith.constant 0 : index
    %c0_15 = arith.constant 0 : index
    %23 = vector.load %arg6[%c0_14, %c0_15] : memref<128x16xbf16, #tpu.memory_space<vmem>>, vector<128x16xbf16>
    %cst_16 = arith.constant dense<0.000000e+00> : vector<64x16xf32>
    %24 = tpu.matmul %22, %23, %cst_16 {dimension_numbers = #tpu.dot_dimension_numbers<[1], [0], [0], [1], [0, 0, 1, 1], [], []>} : vector<64x128xbf16>, vector<128x16xbf16>, vector<64x16xf32> -> vector<64x16xf32>
    %c0_17 = arith.constant 0 : index
    %c0_18 = arith.constant 0 : index
    %25 = vector.load %arg7[%c0_17, %c0_18] : memref<1x16xf32, #tpu.memory_space<vmem>>, vector<1x16xf32>
    %26 = vector.broadcast %25 : vector<1x16xf32> to vector<64x16xf32>
    %27 = arith.addf %24, %26 : vector<64x16xf32>
    %c0_19 = arith.constant 0 : index
    %c0_20 = arith.constant 0 : index
    %28 = vector.load %arg8[%c0_19, %c0_20] : memref<64x16xf32, #tpu.memory_space<vmem>>, vector<64x16xf32>
    tpu.vector_store %arg8[%c0_19, %c0_20], %27 {strides = array<i32>} : memref<64x16xf32, #tpu.memory_space<vmem>>, vector<64x16xf32>,
    return
  }
  func.func @transform_0(%arg0: i32) -> (i32, i32) {
    %c0_i32 = arith.constant 0 : i32
    %c0_i32_0 = arith.constant 0 : i32
    return %arg0, %c0_i32 : i32, i32
  }
  func.func @transform_1(%arg0: i32) -> (i32, i32) {
    %c0_i32 = arith.constant 0 : i32
    %c0_i32_0 = arith.constant 0 : i32
    %c0_i32_1 = arith.constant 0 : i32
    return %c0_i32, %c0_i32_0 : i32, i32
  }
  func.func @transform_2(%arg0: i32) -> (i32, i32) {
    %c0_i32 = arith.constant 0 : i32
    %c0_i32_0 = arith.constant 0 : i32
    %c0_i32_1 = arith.constant 0 : i32
    return %c0_i32, %c0_i32_0 : i32, i32
  }
  func.func @transform_3(%arg0: i32) -> (i32, i32) {
    %c0_i32 = arith.constant 0 : i32
    %c0_i32_0 = arith.constant 0 : i32
    %c0_i32_1 = arith.constant 0 : i32
    return %c0_i32, %c0_i32_0 : i32, i32
  }
  func.func @transform_4(%arg0: i32) -> (i32, i32) {
    %c0_i32 = arith.constant 0 : i32
    %c0_i32_0 = arith.constant 0 : i32
    %c0_i32_1 = arith.constant 0 : i32
    return %c0_i32, %c0_i32_0 : i32, i32
  }
  func.func @transform_5(%arg0: i32) -> (i32, i32) {
    %c0_i32 = arith.constant 0 : i32
    %c0_i32_0 = arith.constant 0 : i32
    %c0_i32_1 = arith.constant 0 : i32
    return %c0_i32, %c0_i32_0 : i32, i32
  }
  func.func @transform_6(%arg0: i32) -> (i32, i32) {
    %c0_i32 = arith.constant 0 : i32
    %c0_i32_0 = arith.constant 0 : i32
    %c0_i32_1 = arith.constant 0 : i32
    return %c0_i32, %c0_i32_0 : i32, i32
  }
  func.func @transform_7(%arg0: i32) -> (i32, i32) {
    %c0_i32 = arith.constant 0 : i32
    %c0_i32_0 = arith.constant 0 : i32
    return %arg0, %c0_i32 : i32, i32
  }
}

</mosaic_0001>

<bundles_post_ra>
// kernel: tpu_custom_call.1
= control target key start
LH: loop header
LB: loop body
LE: loop exit
PB: predicated region body
PF: predicated region fallthrough
CT: control target
= control target key end

     0   :  { %12 = vsyncpa [#allocation3], 0  ;;  %s1359_s0 = inlined_call_operand.vmem [shape: bf16[128,128], index: 0, kind: input, shape index: {}]   ;;  %s1360_s1 = inlined_call_operand.hbm [shape: bf16[128,128], index: 1, kind: input, shape index: {}]   ;;  %s1361_s2 = inlined_call_operand.vmem [shape: f32[1,128], index: 2, kind: input, shape index: {}]   ;;  %s1362_s3 = inlined_call_operand.hbm [shape: bf16[128,128], index: 3, kind: input, shape index: {}]   ;;  %s1363_s4 = inlined_call_operand.vmem [shape: f32[1,128], index: 4, kind: input, shape index: {}]   ;;  %s1364_s5 = inlined_call_operand.vmem [shape: bf16[128,16], index: 5, kind: input, shape index: {}]   ;;  %s1365_s6 = inlined_call_operand.vmem [shape: f32[1,16], index: 6, kind: input, shape index: {}]   ;;  %s1366_s7 = inlined_call_operand.vmem [shape: f32[128,16], index: 7, kind: output, shape index: {}]  }
   0x1   :  { %13 = vsyncpa [#allocation5], 0  ;;  %s1237_s24 = smov 0  }
   0x2 LB: > { %s896_s25 = sadd.s32 4294967295, %s1191_s24   ;;  %p898_p0 = scmp.ge.s32.totalorder %s1191_s24, 1  ;;  %s1191_s24 = sphi %s1237_s24, %s19_s24  }
   0x3   : > { %p202_p1 = scmp.lt.s32.totalorder %s1191_s24, 3  ;;  %s1193_s26 = smov [#allocation2]  }
   0x4   : > { %s214_s27 = sshll.u32 %s1193_s26, 4  ;;  %p1251_p3 = scmp.eq.s32.totalorder %s896_s25, 0  ;;  %s215_s27 = int_to_ptr.vmem [resolvable:$true] %s214_s27 }
   0x5   : > { %p1245_p2 = pnand %p898_p0, %p202_p1  ;;  %s1194_s30 = smov [#allocation4]  }
   0x6   : > { %s230_s8 = sshll.u32 %s1194_s30, 4  ;;  %s1136_s10 = scalar_lea.vmem %s215_s27, 1024  ;;  %s231_s8 = int_to_ptr.vmem [resolvable:$true] %s230_s8 }
   0x7   : > { %p1074_p4 = pneg %p1245_p2  ;;  %p1137_p7 = scmp.ne.s32.totalorder %s215_s27, %s1136_s10 }
   0x8   : > { %p1144_p10 = scmp.lt.s32.totalorder %s215_s27, %s215_s27  ;;  %p1145_p11 = scmp.lt.s32.totalorder %s1136_s10, %s1136_s10 }
   0x9   : > { %p1259_p5 = pnand %p1251_p3, %p1074_p4 }
   0xa   : > { %p1146_p12 = por %p1145_p11, %p1144_p10 }
   0xb   : > { %p1127_p6 = pneg %p1259_p5 }
   0xd   : > { %p1139_p8 = pnand %p1137_p7, %p1127_p6 }
   0xf   : > { %p1140_p9 = pneg %p1139_p8 }
  0x11   : > { %p1147_p13 = pnand %p1146_p12, %p1140_p9 }
  0x13   : > { %1150 = shalt.err (!%p1147_p13)
}
  0x14   : > { %s1195_s11 = smov 64   ;;  %s1196_s12 = smov 4  }
  0x15   : > { %1077 = dma.hbm_to_vmem [thread:$0]  (!%p1259_p5), %s1360_s1, 1024, %s215_s27, [#allocation3], %s1195_s11, %s1195_s11, %s1196_s12  }
  0x16   : > { %s1162_s15 = scalar_lea.vmem %s231_s8, 1024  ;;  %p1170_p7 = scmp.lt.s32.totalorder %s231_s8, %s231_s8 }
  0x17   : > { %p1163_p0 = scmp.ne.s32.totalorder %s231_s8, %s1162_s15  ;;  %p1171_p8 = scmp.lt.s32.totalorder %s1162_s15, %s1162_s15 }
  0x19   : > { %p1165_p1 = pnand %p1163_p0, %p1127_p6  ;;  %p1172_p10 = por %p1171_p8, %p1170_p7 }
  0x1b   : > { %p1166_p4 = pneg %p1165_p1 }
  0x1d   : > { %p1173_p9 = pnand %p1172_p10, %p1166_p4 }
  0x1f   : > { %1176 = shalt.err (!%p1173_p9)
}
  0x20   : > { %1080 = dma.hbm_to_vmem [thread:$0]  (!%p1259_p5), %s1362_s3, 1024, %s231_s8, [#allocation5], %s1195_s11, %s1195_s11, %s1196_s12  }
  0x21   : > { %264 = sbr.rel (%p1245_p2) target bundleno = 698 (0x2ba), region = 48 }
  0x26   : > { %1182 = dma.done.wait (%p1251_p3), [#allocation3], 1024  }
  0x27   : > { %1184 = vsyncadd (%p1251_p3), [#allocation3], 4294966272 }
  0x28   : > { %1186 = dma.done.wait (%p1251_p3), [#allocation5], 1024  }
  0x29   : > { %1188 = vsyncadd (%p1251_p3), [#allocation5], 4294966272  ;;  %s905_s18 = sshll.u32 %s896_s25, 3  ;;  %v1097_v0 = vld [vmem:[#allocation2 + $0x38] sm:$0xff]   ;;  %v1098_v1 = vld [vmem:[#allocation2 + $0x30] sm:$0xff]  }
  0x2a   : > { %p301_p6 = scmp.lt.s32.totalorder %s905_s18, 15  ;;  %978 = vmatprep.subr.bf16.mxu0 %v1097_v0  ;;  %v1099_v2 = vld [vmem:[#allocation2 + $0x28] sm:$0xff]   ;;  %v1100_v3 = vld [vmem:[#allocation2 + $0x20] sm:$0xff]   ;;  %v1101_v5 = vld [vmem:[#allocation2 + $0x18] sm:$0xff]  }
  0x2b   : > { %979 = vmatpush3.bf16.msra.mxu0 %v1097_v0  ;;  %v1109_v6 = vld [vmem:[#allocation4 + $0x38] sm:$0xff]   ;;  %v1110_v7 = vld [vmem:[#allocation4 + $0x30] sm:$0xff]   ;;  %v1111_v9 = vld [vmem:[#allocation4 + $0x28] sm:$0xff]  }
  0x2c   : > { %s1371_s18 = smov (!%p301_p6, %s905_s18), 15  ;;  %980 = vmatprep.subr.bf16.mxu0 %v1098_v1  ;;  %1002 = vmatprep.subr.bf16.mxu1 %v1109_v6  ;;  %v1102_v8 = vld [vmem:[#allocation2 + $0x10] sm:$0xff]   ;;  %v1103_v10 = vld [vmem:[#allocation2 + $0x8] sm:$0xff]   ;;  %v1112_v11 = vld [vmem:[#allocation4 + $0x20] sm:$0xff]  }
  0x2d   : > { %s906_s19 = sshll.u32 %s1371_s18, 2  ;;  %1003 = vmatpush3.bf16.msra.mxu1 %v1109_v6  ;;  %v1104_v12 = vld [vmem:[#allocation2] sm:$0xff]   ;;  %v1113_v13 = vld [vmem:[#allocation4 + $0x18] sm:$0xff]   ;;  %v1114_v17 = vld [vmem:[#allocation4 + $0x10] sm:$0xff]  }
  0x2e   : > { %s1299_s22 = scalar_lea.vmem %s1359_s0, %s906_s19  ;;  %1004 = vmatprep.subr.bf16.mxu1 %v1110_v7  ;;  %v1115_v18 = vld [vmem:[#allocation4 + $0x8] sm:$0xff]   ;;  %v1116_v19 = vld [vmem:[#allocation4] sm:$0xff]   ;;  %v1117_v20 = vld [vmem:[%s1364_s5 + $0x38] sm:$0xff]  }
  0x2f   : > { %981 = vmatpush3.bf16.msra.mxu0 %v1098_v1  ;;  %v1105_v4 = vld [vmem:[%s1299_s22] sm:$0xff]   ;;  %v1106_v14 = vld [vmem:[%s1299_s22 + $0x8] sm:$0xff]   ;;  %v1107_v15 = vld [vmem:[%s1299_s22 + $0x10] sm:$0xff]  }
  0x30   : > { %982 = vmatprep.subr.bf16.mxu0 %v1099_v2  ;;  %994 = vmatprep.mubr.bf16.mxu0 %v1105_v4  ;;  %v1108_v16 = vld [vmem:[%s1299_s22 + $0x18] sm:$0xff]   ;;  %v1311_v21 = vld [vmem:[%s1364_s5 + $0x30] sm:$0xff]   ;;  %v1119_v22 = vld [vmem:[%s1364_s5 + $0x28] sm:$0xff]   ;;  %s908_s22 = sshll.u32 %s1371_s18, 3 }
  0x31   : > { %1005 = vmatpush3.bf16.msra.mxu1 %v1110_v7  ;;  %v1120_v23 = vld [vmem:[%s1364_s5 + $0x20] sm:$0xff]   ;;  %v1121_v24 = vld [vmem:[%s1364_s5 + $0x18] sm:$0xff]   ;;  %v1122_v62 = vld [vmem:[%s1364_s5 + $0x10] sm:$0xff]   ;;  %s310_s28 = scalar_lea.vmem %s1366_s7, %s908_s22 }
  0x32   : > { %1006 = vmatprep.subr.bf16.mxu1 %v1111_v9  ;;  %v909_v26 = vld [vmem:[%s1361_s2] ss:$0 sm:$0xff]  ;;  %v1123_v63 = vld [vmem:[%s1364_s5 + $0x8] sm:$0xff]  }
  0x33   : > { %983 = vmatpush3.bf16.msra.mxu0 %v1099_v2  ;;  %v1124_v0 = vld [vmem:[%s1364_s5] sm:$0xff]  }
  0x34   : > { %984 = vmatprep.subr.bf16.mxu0 %v1100_v3  ;;  %v922_v2 = vld [vmem:[%s1363_s4] ss:$0 sm:$0xff] }
  0x35   : > { %1007 = vmatpush3.bf16.msra.mxu1 %v1111_v9 }
  0x36   : > { %1008 = vmatprep.subr.bf16.mxu1 %v1112_v11 }
  0x37   : > { %985 = vmatpush3.bf16.msra.mxu0 %v1100_v3 }
  0x38   : > { %986 = vmatprep.subr.bf16.mxu0 %v1101_v5 }
  0x39   : > { %1009 = vmatpush3.bf16.msra.mxu1 %v1112_v11 }
  0x3a   : > { %1010 = vmatprep.subr.bf16.mxu1 %v1113_v13 }
  0x3b   : > { %987 = vmatpush3.bf16.msra.mxu0 %v1101_v5 }
  0x3c   : > { %988 = vmatprep.subr.bf16.mxu0 %v1102_v8 }
  0x3d   : > { %1011 = vmatpush3.bf16.msra.mxu1 %v1113_v13 }
  0x3e   : > { %1012 = vmatprep.subr.bf16.mxu1 %v1114_v17 }
  0x3f   : > { %989 = vmatpush3.bf16.msra.mxu0 %v1102_v8 }
  0x40   : > { %990 = vmatprep.subr.bf16.mxu0 %v1103_v10 }
  0x41   : > { %1013 = vmatpush3.bf16.msra.mxu1 %v1114_v17 }
  0x42   : > { %1014 = vmatprep.subr.bf16.mxu1 %v1115_v18 }
  0x43   : > { %991 = vmatpush3.bf16.msra.mxu0 %v1103_v10 }
  0x44   : > { %992 = vmatprep.subr.bf16.mxu0 %v1104_v12 }
  0x45   : > { %1015 = vmatpush3.bf16.msra.mxu1 %v1115_v18 }
  0x46   : > { %1016 = vmatprep.subr.bf16.mxu1 %v1116_v19 }
  0x47   : > { %993 = vmatpush3.bf16.msra.mxu0 %v1104_v12 }
  0x48   : > { %1026 = vmatprep.subr.bf16.mxu0 %v1117_v20 }
  0x49   : > { %1017 = vmatpush3.bf16.msra.mxu1 %v1116_v19 }
  0x4a   : > { %995 = vmatmul.mubr.bf16.vlgmr.msra.gmra.mxu0 %v1106_v14  ;;  %1050 = vmatprep.subr.bf16.mxu1 %v1117_v20 }
  0x4b   : > { %998 = vmatprep.mubr.bf16.mxu0 %v1107_v15  ;;  %1027 = vmatpush3.bf16.msra.mxu0 %v1117_v20 }
  0x4c   : > { %1028 = vmatprep.subr.bf16.mxu0 %v1311_v21 }
  0x4f   : > { %1029 = vmatpush3.bf16.msra.mxu0 %v1311_v21 }
  0x50   : > { %1030 = vmatprep.subr.bf16.mxu0 %v1119_v22 }
  0x52   : > { %999 = vmatmul.mubr.bf16.gmra.mxu0 %v1108_v16 }
  0x53   : > { %1031 = vmatpush3.bf16.msra.mxu0 %v1119_v22 }
  0x54   : > { %1032 = vmatprep.subr.bf16.mxu0 %v1120_v23 }
  0x57   : > { %1033 = vmatpush3.bf16.msra.mxu0 %v1120_v23 }
  0x58   : > { %1034 = vmatprep.subr.bf16.mxu0 %v1121_v24 }
  0x5b   : > { %1035 = vmatpush3.bf16.msra.mxu0 %v1121_v24 }
  0x5c   : > { %1036 = vmatprep.subr.bf16.mxu0 %v1122_v62 }
  0x5f   : > { %1037 = vmatpush3.bf16.msra.mxu0 %v1122_v62 }
  0x60   : > { %1038 = vmatprep.subr.bf16.mxu0 %v1123_v63 }
  0x63   : > { %1039 = vmatpush3.bf16.msra.mxu0 %v1123_v63 }
  0x64   : > { %1040 = vmatprep.subr.bf16.mxu0 %v1124_v0 }
  0x67   : > { %1041 = vmatpush3.bf16.msra.mxu0 %v1124_v0 }
 0x10a   : > { %v996_v25 = vpop.f32.mrf.mxu0 }
 0x10b   : > { %v459_v29 = vadd.f32 %v996_v25, %v909_v26 }
 0x10c   : > { %v450_v27 = vpop.f32.mrf.mxu0 }
 0x10d   : > { %v451_v28 = vadd.f32 %v909_v26, %v450_v27  ;;  %v491_v36 = vmul.f32 0.01, %v459_v29  ;;  %vm483_vm2 = vcmp.gt.f32.partialorder %v459_v29, 0.0 }
 0x10e   : > { %v997_v30 = vpop.f32.mrf.mxu0 }
 0x10f   : > { %v462_v31 = vadd.f32 %v997_v30, %v909_v26  ;;  %v489_v33 = vmul.f32 0.01, %v451_v28  ;;  %vm481_vm1 = vcmp.gt.f32.partialorder %v451_v28, 0.0  ;;  %v499_v47 = vsel %vm483_vm2, %v459_v29, %v491_v36 }
 0x110   : > { %v453_v32 = vpop.f32.mrf.mxu0 }
 0x111   : > { %vm484_vm0 = vcmp.gt.f32.partialorder %v462_v31, 0.0  ;;  %v492_v34 = vmul.f32 0.01, %v462_v31  ;;  %v454_v35 = vadd.f32 %v909_v26, %v453_v32  ;;  %v497_v42 = vsel %vm481_vm1, %v451_v28, %v489_v33 }
 0x112   : > { %v1000_v37 = vpop.f32.mrf.mxu0 }
 0x113   : > { %v490_v38 = vmul.f32 0.01, %v454_v35  ;;  %vm482_vm3 = vcmp.gt.f32.partialorder %v454_v35, 0.0  ;;  %v500_v40 = vsel %vm484_vm0, %v462_v31, %v492_v34  ;;  %v475_v44 = vadd.f32 %v1000_v37, %v909_v26 }
 0x114   : > { %v466_v39 = vpop.f32.mrf.mxu0  ;;  %v506_v49 = vpack.c.bf16 %v500_v40, %v499_v47  ;;  %vm809_vm0 = vcmask 130048  }
 0x115   : > { %v467_v41 = vadd.f32 %v909_v26, %v466_v39  ;;  %v498_v43 = vsel %vm482_vm3, %v454_v35, %v490_v38  ;;  %v495_v54 = vmul.f32 0.01, %v475_v44  ;;  %vm487_vm6 = vcmp.gt.f32.partialorder %v475_v44, 0.0  ;;  %v931_v38 = vld [vmem:[%s1365_s6] ss:$0 sm:$0xff] }
 0x116   : > { %v1001_v45 = vpop.f32.mrf.mxu0  ;;  %v505_v46 = vpack.c.bf16 %v498_v43, %v497_v42 }
 0x117   : > { %v478_v48 = vadd.f32 %v1001_v45, %v909_v26  ;;  %v493_v51 = vmul.f32 0.01, %v467_v41  ;;  %vm485_vm5 = vcmp.gt.f32.partialorder %v467_v41, 0.0  ;;  %v503_v60 = vsel %vm487_vm6, %v475_v44, %v495_v54 }
 0x118   : > { %v469_v50 = vpop.f32.mrf.mxu0  ;;  %1018 = vmatprep.mubr.bf16.mxu1 %v505_v46 }
 0x119   : > { %vm488_vm4 = vcmp.gt.f32.partialorder %v478_v48, 0.0  ;;  %v496_v52 = vmul.f32 0.01, %v478_v48  ;;  %v470_v53 = vadd.f32 %v909_v26, %v469_v50  ;;  %1019 = vmatmul.mubr.bf16.vlgmr.msra.gmra.mxu1 %v506_v49  ;;  %v501_v57 = vsel %vm485_vm5, %v467_v41, %v493_v51 }
 0x11a   : > { %1058 = vmatpush3.bf16.msra.mxu1 %v1117_v20 }
 0x11b   : > { %vm486_vm7 = vcmp.gt.f32.partialorder %v470_v53, 0.0  ;;  %v494_v55 = vmul.f32 0.01, %v470_v53  ;;  %1051 = vmatprep.subr.bf16.mxu1 %v1311_v21  ;;  %v504_v56 = vsel %vm488_vm4, %v478_v48, %v496_v52 }
 0x11c   : > { %v508_v61 = vpack.c.bf16 %v504_v56, %v503_v60 }
 0x11d   : > { %v502_v58 = vsel %vm486_vm7, %v470_v53, %v494_v55 }
 0x11e   : > { %v507_v59 = vpack.c.bf16 %v502_v58, %v501_v57  ;;  %1059 = vmatpush3.bf16.msra.mxu1 %v1311_v21 }
 0x11f   : > { %1052 = vmatprep.subr.bf16.mxu1 %v1119_v22 }
 0x120   : > { %1022 = vmatprep.mubr.bf16.mxu1 %v507_v59 }
 0x121   : > { %1023 = vmatmul.mubr.bf16.gmra.mxu1 %v508_v61 }
 0x122   : > { %1060 = vmatpush3.bf16.msra.mxu1 %v1119_v22 }
 0x123   : > { %1053 = vmatprep.subr.bf16.mxu1 %v1120_v23 }
 0x126   : > { %1061 = vmatpush3.bf16.msra.mxu1 %v1120_v23 }
 0x127   : > { %1054 = vmatprep.subr.bf16.mxu1 %v1121_v24 }
 0x12a   : > { %1062 = vmatpush3.bf16.msra.mxu1 %v1121_v24 }
 0x12b   : > { %1055 = vmatprep.subr.bf16.mxu1 %v1122_v62 }
 0x12e   : > { %1063 = vmatpush3.bf16.msra.mxu1 %v1122_v62 }
 0x12f   : > { %1056 = vmatprep.subr.bf16.mxu1 %v1123_v63 }
 0x132   : > { %1064 = vmatpush3.bf16.msra.mxu1 %v1123_v63 }
 0x133   : > { %1057 = vmatprep.subr.bf16.mxu1 %v1124_v0 }
 0x136   : > { %1065 = vmatpush3.bf16.msra.mxu1 %v1124_v0 }
 0x1d9   : > { %v1020_v1 = vpop.f32.mrf.mxu1 }
 0x1da   : > { %v623_v5 = vadd.f32 %v1020_v1, %v922_v2 }
 0x1db   : > { %v614_v3 = vpop.f32.mrf.mxu1 }
 0x1dc   : > { %v615_v4 = vadd.f32 %v922_v2, %v614_v3  ;;  %v655_v12 = vmul.f32 0.01, %v623_v5  ;;  %vm647_vm10 = vcmp.gt.f32.partialorder %v623_v5, 0.0 }
 0x1dd   : > { %v1021_v6 = vpop.f32.mrf.mxu1 }
 0x1de   : > { %v626_v7 = vadd.f32 %v1021_v6, %v922_v2  ;;  %v653_v9 = vmul.f32 0.01, %v615_v4  ;;  %vm645_vm9 = vcmp.gt.f32.partialorder %v615_v4, 0.0  ;;  %v663_v20 = vsel %vm647_vm10, %v623_v5, %v655_v12 }
 0x1df   : > { %v617_v8 = vpop.f32.mrf.mxu1 }
 0x1e0   : > { %vm648_vm8 = vcmp.gt.f32.partialorder %v626_v7, 0.0  ;;  %v656_v10 = vmul.f32 0.01, %v626_v7  ;;  %v618_v11 = vadd.f32 %v922_v2, %v617_v8  ;;  %v661_v18 = vsel %vm645_vm9, %v615_v4, %v653_v9 }
 0x1e1   : > { %v1024_v13 = vpop.f32.mrf.mxu1 }
 0x1e2   : > { %vm646_vm11 = vcmp.gt.f32.partialorder %v618_v11, 0.0  ;;  %v654_v14 = vmul.f32 0.01, %v618_v11  ;;  %v664_v15 = vsel %vm648_vm8, %v626_v7, %v656_v10  ;;  %v639_v21 = vadd.f32 %v1024_v13, %v922_v2 }
 0x1e3   : > { %v630_v16 = vpop.f32.mrf.mxu1  ;;  %v670_v24 = vpack.c.bf16 %v664_v15, %v663_v20 }
 0x1e4   : > { %v631_v17 = vadd.f32 %v922_v2, %v630_v16  ;;  %v662_v19 = vsel %vm646_vm11, %v618_v11, %v654_v14  ;;  %v659_v30 = vmul.f32 0.01, %v639_v21  ;;  %vm651_vm14 = vcmp.gt.f32.partialorder %v639_v21, 0.0 }
 0x1e5   : > { %v1025_v22 = vpop.f32.mrf.mxu1  ;;  %v669_v23 = vpack.c.bf16 %v662_v19, %v661_v18 }
 0x1e6   : > { %v642_v25 = vadd.f32 %v1025_v22, %v922_v2  ;;  %v657_v27 = vmul.f32 0.01, %v631_v17  ;;  %vm649_vm13 = vcmp.gt.f32.partialorder %v631_v17, 0.0  ;;  %v667_v35 = vsel %vm651_vm14, %v639_v21, %v659_v30 }
 0x1e7   : > { %v633_v26 = vpop.f32.mrf.mxu1  ;;  %1042 = vmatprep.mubr.bf16.mxu0 %v669_v23 }
 0x1e8   : > { %vm652_vm12 = vcmp.gt.f32.partialorder %v642_v25, 0.0  ;;  %v660_v28 = vmul.f32 0.01, %v642_v25  ;;  %v634_v29 = vadd.f32 %v922_v2, %v633_v26  ;;  %1043 = vmatmul.mubr.bf16.vlgmr.msra.gmra.mxu0 %v670_v24  ;;  %v665_v33 = vsel %vm649_vm13, %v631_v17, %v657_v27 }
 0x1ea   : > { %vm650_vm15 = vcmp.gt.f32.partialorder %v634_v29, 0.0  ;;  %v658_v31 = vmul.f32 0.01, %v634_v29  ;;  %v668_v32 = vsel %vm652_vm12, %v642_v25, %v660_v28 }
 0x1eb   : > { %v672_v37 = vpack.c.bf16 %v668_v32, %v667_v35 }
 0x1ec   : > { %v666_v34 = vsel %vm650_vm15, %v634_v29, %v658_v31 }
 0x1ed   : > { %v671_v36 = vpack.c.bf16 %v666_v34, %v665_v33 }
 0x1ef   : > { %1046 = vmatprep.mubr.bf16.mxu1 %v671_v36 }
 0x1f0   : > { %1047 = vmatmul.mubr.bf16.vlgmr.msra.gmra.mxu1 %v672_v37 }
 0x2a8   : > { %v1044_v39 = vpop.f32.mrf.mxu0 }
 0x2a9   : > { %v787_v40 = vadd.f32 %v1044_v39, %v931_v38 }
 0x2aa   : > { %v778_v41 = vpop.f32.mrf.mxu0 }
 0x2ab   : > { %812 = vst.msk [vmem:[%s310_s28 + $0x10] sm:$0xff] %vm809_vm0, %v787_v40  ;;  %v779_v42 = vadd.f32 %v931_v38, %v778_v41 }
 0x2ac   : > { %v1045_v43 = vpop.f32.mrf.mxu0 }
 0x2ad   : > { %810 = vst.msk [vmem:[%s310_s28] sm:$0xff] %vm809_vm0, %v779_v42  ;;  %v790_v44 = vadd.f32 %v1045_v43, %v931_v38 }
 0x2ae   : > { %v781_v45 = vpop.f32.mrf.mxu0 }
 0x2af   : > { %813 = vst.msk [vmem:[%s310_s28 + $0x18] sm:$0xff] %vm809_vm0, %v790_v44  ;;  %v782_v46 = vadd.f32 %v931_v38, %v781_v45 }
 0x2b0   : > { %v1048_v47 = vpop.f32.mrf.mxu1 }
 0x2b1   : > { %811 = vst.msk [vmem:[%s310_s28 + $0x8] sm:$0xff] %vm809_vm0, %v782_v46  ;;  %v803_v48 = vadd.f32 %v1048_v47, %v931_v38 }
 0x2b2   : > { %v794_v49 = vpop.f32.mrf.mxu1 }
 0x2b3   : > { %816 = vst.msk [vmem:[%s310_s28 + $0x30] sm:$0xff] %vm809_vm0, %v803_v48  ;;  %v795_v50 = vadd.f32 %v931_v38, %v794_v49 }
 0x2b4   : > { %v1049_v51 = vpop.f32.mrf.mxu1 }
 0x2b5   : > { %814 = vst.msk [vmem:[%s310_s28 + $0x20] sm:$0xff] %vm809_vm0, %v795_v50  ;;  %v806_v52 = vadd.f32 %v1049_v51, %v931_v38 }
 0x2b6   : > { %v797_v53 = vpop.f32.mrf.mxu1 }
 0x2b7   : > { %817 = vst.msk [vmem:[%s310_s28 + $0x38] sm:$0xff] %vm809_vm0, %v806_v52  ;;  %v798_v54 = vadd.f32 %v931_v38, %v797_v53 }
 0x2b9   : > { %815 = vst.msk [vmem:[%s310_s28 + $0x28] sm:$0xff] %vm809_vm0, %v798_v54 }
 0x2ba PF: > { %s19_s24 = sadd.s32 1, %s1191_s24  }
 0x2bb   : > { %p16_p2 = scmp.ge.s32.totalorder %s19_s24, 4  }
 0x2bd   :  { %18 = sbr.rel (!%p16_p2) target bundleno = 2 (0x2), region = 87 }
 0x2c2   :  { %840 = vsyncpa [#allocation3], 1 }
 0x2c3   :  { %842 = vsyncpa [#allocation3 + $0x1], 1 }
 0x2c4   :  { %843 = vsyncpa [#allocation5], 1 }

// kernel: tpu_custom_call.1
= control target key start
LH: loop header
LB: loop body
LE: loop exit
PB: predicated region body
PF: predicated region fallthrough
CT: control target
= control target key end

     0   :  { %12 = vsyncpa [#allocation3], 0  ;;  %s1359_s0 = inlined_call_operand.vmem [shape: bf16[128,128], index: 0, kind: input, shape index: {}]   ;;  %s1360_s1 = inlined_call_operand.hbm [shape: bf16[128,128], index: 1, kind: input, shape index: {}]   ;;  %s1361_s2 = inlined_call_operand.vmem [shape: f32[1,128], index: 2, kind: input, shape index: {}]   ;;  %s1362_s3 = inlined_call_operand.hbm [shape: bf16[128,128], index: 3, kind: input, shape index: {}]   ;;  %s1363_s4 = inlined_call_operand.vmem [shape: f32[1,128], index: 4, kind: input, shape index: {}]   ;;  %s1364_s5 = inlined_call_operand.vmem [shape: bf16[128,16], index: 5, kind: input, shape index: {}]   ;;  %s1365_s6 = inlined_call_operand.vmem [shape: f32[1,16], index: 6, kind: input, shape index: {}]   ;;  %s1366_s7 = inlined_call_operand.vmem [shape: f32[128,16], index: 7, kind: output, shape index: {}]  }
   0x1   :  { %13 = vsyncpa [#allocation5], 0  ;;  %s1237_s24 = smov 0  }
   0x2 LB: > { %s896_s25 = sadd.s32 4294967295, %s1191_s24   ;;  %p898_p0 = scmp.ge.s32.totalorder %s1191_s24, 1  ;;  %s1191_s24 = sphi %s1237_s24, %s19_s24  }
   0x3   : > { %p202_p1 = scmp.lt.s32.totalorder %s1191_s24, 3  ;;  %s1193_s26 = smov [#allocation2]  }
   0x4   : > { %s214_s27 = sshll.u32 %s1193_s26, 4  ;;  %p1251_p3 = scmp.eq.s32.totalorder %s896_s25, 0  ;;  %s215_s27 = int_to_ptr.vmem [resolvable:$true] %s214_s27 }
   0x5   : > { %p1245_p2 = pnand %p898_p0, %p202_p1  ;;  %s1194_s30 = smov [#allocation4]  }
   0x6   : > { %s230_s8 = sshll.u32 %s1194_s30, 4  ;;  %s1136_s10 = scalar_lea.vmem %s215_s27, 1024  ;;  %s231_s8 = int_to_ptr.vmem [resolvable:$true] %s230_s8 }
   0x7   : > { %p1074_p4 = pneg %p1245_p2  ;;  %p1137_p7 = scmp.ne.s32.totalorder %s215_s27, %s1136_s10 }
   0x8   : > { %p1144_p10 = scmp.lt.s32.totalorder %s215_s27, %s215_s27  ;;  %p1145_p11 = scmp.lt.s32.totalorder %s1136_s10, %s1136_s10 }
   0x9   : > { %p1259_p5 = pnand %p1251_p3, %p1074_p4 }
   0xa   : > { %p1146_p12 = por %p1145_p11, %p1144_p10 }
   0xb   : > { %p1127_p6 = pneg %p1259_p5 }
   0xd   : > { %p1139_p8 = pnand %p1137_p7, %p1127_p6 }
   0xf   : > { %p1140_p9 = pneg %p1139_p8 }
  0x11   : > { %p1147_p13 = pnand %p1146_p12, %p1140_p9 }
  0x13   : > { %1150 = shalt.err (!%p1147_p13)
}
  0x14   : > { %s1195_s11 = smov 64   ;;  %s1196_s12 = smov 4  }
  0x15   : > { %1077 = dma.hbm_to_vmem [thread:$0]  (!%p1259_p5), %s1360_s1, 1024, %s215_s27, [#allocation3], %s1195_s11, %s1195_s11, %s1196_s12  }
  0x16   : > { %s1162_s15 = scalar_lea.vmem %s231_s8, 1024  ;;  %p1170_p7 = scmp.lt.s32.totalorder %s231_s8, %s231_s8 }
  0x17   : > { %p1163_p0 = scmp.ne.s32.totalorder %s231_s8, %s1162_s15  ;;  %p1171_p8 = scmp.lt.s32.totalorder %s1162_s15, %s1162_s15 }
  0x19   : > { %p1165_p1 = pnand %p1163_p0, %p1127_p6  ;;  %p1172_p10 = por %p1171_p8, %p1170_p7 }
  0x1b   : > { %p1166_p4 = pneg %p1165_p1 }
  0x1d   : > { %p1173_p9 = pnand %p1172_p10, %p1166_p4 }
  0x1f   : > { %1176 = shalt.err (!%p1173_p9)
}
  0x20   : > { %1080 = dma.hbm_to_vmem [thread:$0]  (!%p1259_p5), %s1362_s3, 1024, %s231_s8, [#allocation5], %s1195_s11, %s1195_s11, %s1196_s12  }
  0x21   : > { %264 = sbr.rel (%p1245_p2) target bundleno = 698 (0x2ba), region = 48 }
  0x26   : > { %1182 = dma.done.wait (%p1251_p3), [#allocation3], 1024  }
  0x27   : > { %1184 = vsyncadd (%p1251_p3), [#allocation3], 4294966272 }
  0x28   : > { %1186 = dma.done.wait (%p1251_p3), [#allocation5], 1024  }
  0x29   : > { %1188 = vsyncadd (%p1251_p3), [#allocation5], 4294966272  ;;  %s905_s18 = sshll.u32 %s896_s25, 3  ;;  %v1097_v0 = vld [vmem:[#allocation2 + $0x38] sm:$0xff]   ;;  %v1098_v1 = vld [vmem:[#allocation2 + $0x30] sm:$0xff]  }
  0x2a   : > { %p301_p6 = scmp.lt.s32.totalorder %s905_s18, 15  ;;  %978 = vmatprep.subr.bf16.mxu0 %v1097_v0  ;;  %v1099_v2 = vld [vmem:[#allocation2 + $0x28] sm:$0xff]   ;;  %v1100_v3 = vld [vmem:[#allocation2 + $0x20] sm:$0xff]   ;;  %v1101_v5 = vld [vmem:[#allocation2 + $0x18] sm:$0xff]  }
  0x2b   : > { %979 = vmatpush3.bf16.msra.mxu0 %v1097_v0  ;;  %v1109_v6 = vld [vmem:[#allocation4 + $0x38] sm:$0xff]   ;;  %v1110_v7 = vld [vmem:[#allocation4 + $0x30] sm:$0xff]   ;;  %v1111_v9 = vld [vmem:[#allocation4 + $0x28] sm:$0xff]  }
  0x2c   : > { %s1371_s18 = smov (!%p301_p6, %s905_s18), 15  ;;  %980 = vmatprep.subr.bf16.mxu0 %v1098_v1  ;;  %1002 = vmatprep.subr.bf16.mxu1 %v1109_v6  ;;  %v1102_v8 = vld [vmem:[#allocation2 + $0x10] sm:$0xff]   ;;  %v1103_v10 = vld [vmem:[#allocation2 + $0x8] sm:$0xff]   ;;  %v1112_v11 = vld [vmem:[#allocation4 + $0x20] sm:$0xff]  }
  0x2d   : > { %s906_s19 = sshll.u32 %s1371_s18, 2  ;;  %1003 = vmatpush3.bf16.msra.mxu1 %v1109_v6  ;;  %v1104_v12 = vld [vmem:[#allocation2] sm:$0xff]   ;;  %v1113_v13 = vld [vmem:[#allocation4 + $0x18] sm:$0xff]   ;;  %v1114_v17 = vld [vmem:[#allocation4 + $0x10] sm:$0xff]  }
  0x2e   : > { %s1299_s22 = scalar_lea.vmem %s1359_s0, %s906_s19  ;;  %1004 = vmatprep.subr.bf16.mxu1 %v1110_v7  ;;  %v1115_v18 = vld [vmem:[#allocation4 + $0x8] sm:$0xff]   ;;  %v1116_v19 = vld [vmem:[#allocation4] sm:$0xff]   ;;  %v1117_v20 = vld [vmem:[%s1364_s5 + $0x38] sm:$0xff]  }
  0x2f   : > { %981 = vmatpush3.bf16.msra.mxu0 %v1098_v1  ;;  %v1105_v4 = vld [vmem:[%s1299_s22] sm:$0xff]   ;;  %v1106_v14 = vld [vmem:[%s1299_s22 + $0x8] sm:$0xff]   ;;  %v1107_v15 = vld [vmem:[%s1299_s22 + $0x10] sm:$0xff]  }
  0x30   : > { %982 = vmatprep.subr.bf16.mxu0 %v1099_v2  ;;  %994 = vmatprep.mubr.bf16.mxu0 %v1105_v4  ;;  %v1108_v16 = vld [vmem:[%s1299_s22 + $0x18] sm:$0xff]   ;;  %v1311_v21 = vld [vmem:[%s1364_s5 + $0x30] sm:$0xff]   ;;  %v1119_v22 = vld [vmem:[%s1364_s5 + $0x28] sm:$0xff]   ;;  %s908_s22 = sshll.u32 %s1371_s18, 3 }
  0x31   : > { %1005 = vmatpush3.bf16.msra.mxu1 %v1110_v7  ;;  %v1120_v23 = vld [vmem:[%s1364_s5 + $0x20] sm:$0xff]   ;;  %v1121_v24 = vld [vmem:[%s1364_s5 + $0x18] sm:$0xff]   ;;  %v1122_v62 = vld [vmem:[%s1364_s5 + $0x10] sm:$0xff]   ;;  %s310_s28 = scalar_lea.vmem %s1366_s7, %s908_s22 }
  0x32   : > { %1006 = vmatprep.subr.bf16.mxu1 %v1111_v9  ;;  %v909_v26 = vld [vmem:[%s1361_s2] ss:$0 sm:$0xff]  ;;  %v1123_v63 = vld [vmem:[%s1364_s5 + $0x8] sm:$0xff]  }
  0x33   : > { %983 = vmatpush3.bf16.msra.mxu0 %v1099_v2  ;;  %v1124_v0 = vld [vmem:[%s1364_s5] sm:$0xff]  }
  0x34   : > { %984 = vmatprep.subr.bf16.mxu0 %v1100_v3  ;;  %v922_v2 = vld [vmem:[%s1363_s4] ss:$0 sm:$0xff] }
  0x35   : > { %1007 = vmatpush3.bf16.msra.mxu1 %v1111_v9 }
  0x36   : > { %1008 = vmatprep.subr.bf16.mxu1 %v1112_v11 }
  0x37   : > { %985 = vmatpush3.bf16.msra.mxu0 %v1100_v3 }
  0x38   : > { %986 = vmatprep.subr.bf16.mxu0 %v1101_v5 }
  0x39   : > { %1009 = vmatpush3.bf16.msra.mxu1 %v1112_v11 }
  0x3a   : > { %1010 = vmatprep.subr.bf16.mxu1 %v1113_v13 }
  0x3b   : > { %987 = vmatpush3.bf16.msra.mxu0 %v1101_v5 }
  0x3c   : > { %988 = vmatprep.subr.bf16.mxu0 %v1102_v8 }
  0x3d   : > { %1011 = vmatpush3.bf16.msra.mxu1 %v1113_v13 }
  0x3e   : > { %1012 = vmatprep.subr.bf16.mxu1 %v1114_v17 }
  0x3f   : > { %989 = vmatpush3.bf16.msra.mxu0 %v1102_v8 }
  0x40   : > { %990 = vmatprep.subr.bf16.mxu0 %v1103_v10 }
  0x41   : > { %1013 = vmatpush3.bf16.msra.mxu1 %v1114_v17 }
  0x42   : > { %1014 = vmatprep.subr.bf16.mxu1 %v1115_v18 }
  0x43   : > { %991 = vmatpush3.bf16.msra.mxu0 %v1103_v10 }
  0x44   : > { %992 = vmatprep.subr.bf16.mxu0 %v1104_v12 }
  0x45   : > { %1015 = vmatpush3.bf16.msra.mxu1 %v1115_v18 }
  0x46   : > { %1016 = vmatprep.subr.bf16.mxu1 %v1116_v19 }
  0x47   : > { %993 = vmatpush3.bf16.msra.mxu0 %v1104_v12 }
  0x48   : > { %1026 = vmatprep.subr.bf16.mxu0 %v1117_v20 }
  0x49   : > { %1017 = vmatpush3.bf16.msra.mxu1 %v1116_v19 }
  0x4a   : > { %995 = vmatmul.mubr.bf16.vlgmr.msra.gmra.mxu0 %v1106_v14  ;;  %1050 = vmatprep.subr.bf16.mxu1 %v1117_v20 }
  0x4b   : > { %998 = vmatprep.mubr.bf16.mxu0 %v1107_v15  ;;  %1027 = vmatpush3.bf16.msra.mxu0 %v1117_v20 }
  0x4c   : > { %1028 = vmatprep.subr.bf16.mxu0 %v1311_v21 }
  0x4f   : > { %1029 = vmatpush3.bf16.msra.mxu0 %v1311_v21 }
  0x50   : > { %1030 = vmatprep.subr.bf16.mxu0 %v1119_v22 }
  0x52   : > { %999 = vmatmul.mubr.bf16.gmra.mxu0 %v1108_v16 }
  0x53   : > { %1031 = vmatpush3.bf16.msra.mxu0 %v1119_v22 }
  0x54   : > { %1032 = vmatprep.subr.bf16.mxu0 %v1120_v23 }
  0x57   : > { %1033 = vmatpush3.bf16.msra.mxu0 %v1120_v23 }
  0x58   : > { %1034 = vmatprep.subr.bf16.mxu0 %v1121_v24 }
  0x5b   : > { %1035 = vmatpush3.bf16.msra.mxu0 %v1121_v24 }
  0x5c   : > { %1036 = vmatprep.subr.bf16.mxu0 %v1122_v62 }
  0x5f   : > { %1037 = vmatpush3.bf16.msra.mxu0 %v1122_v62 }
  0x60   : > { %1038 = vmatprep.subr.bf16.mxu0 %v1123_v63 }
  0x63   : > { %1039 = vmatpush3.bf16.msra.mxu0 %v1123_v63 }
  0x64   : > { %1040 = vmatprep.subr.bf16.mxu0 %v1124_v0 }
  0x67   : > { %1041 = vmatpush3.bf16.msra.mxu0 %v1124_v0 }
 0x10a   : > { %v996_v25 = vpop.f32.mrf.mxu0 }
 0x10b   : > { %v459_v29 = vadd.f32 %v996_v25, %v909_v26 }
 0x10c   : > { %v450_v27 = vpop.f32.mrf.mxu0 }
 0x10d   : > { %v451_v28 = vadd.f32 %v909_v26, %v450_v27  ;;  %v491_v36 = vmul.f32 0.01, %v459_v29  ;;  %vm483_vm2 = vcmp.gt.f32.partialorder %v459_v29, 0.0 }
 0x10e   : > { %v997_v30 = vpop.f32.mrf.mxu0 }
 0x10f   : > { %v462_v31 = vadd.f32 %v997_v30, %v909_v26  ;;  %v489_v33 = vmul.f32 0.01, %v451_v28  ;;  %vm481_vm1 = vcmp.gt.f32.partialorder %v451_v28, 0.0  ;;  %v499_v47 = vsel %vm483_vm2, %v459_v29, %v491_v36 }
 0x110   : > { %v453_v32 = vpop.f32.mrf.mxu0 }
 0x111   : > { %vm484_vm0 = vcmp.gt.f32.partialorder %v462_v31, 0.0  ;;  %v492_v34 = vmul.f32 0.01, %v462_v31  ;;  %v454_v35 = vadd.f32 %v909_v26, %v453_v32  ;;  %v497_v42 = vsel %vm481_vm1, %v451_v28, %v489_v33 }
 0x112   : > { %v1000_v37 = vpop.f32.mrf.mxu0 }
 0x113   : > { %v490_v38 = vmul.f32 0.01, %v454_v35  ;;  %vm482_vm3 = vcmp.gt.f32.partialorder %v454_v35, 0.0  ;;  %v500_v40 = vsel %vm484_vm0, %v462_v31, %v492_v34  ;;  %v475_v44 = vadd.f32 %v1000_v37, %v909_v26 }
 0x114   : > { %v466_v39 = vpop.f32.mrf.mxu0  ;;  %v506_v49 = vpack.c.bf16 %v500_v40, %v499_v47  ;;  %vm809_vm0 = vcmask 130048  }
 0x115   : > { %v467_v41 = vadd.f32 %v909_v26, %v466_v39  ;;  %v498_v43 = vsel %vm482_vm3, %v454_v35, %v490_v38  ;;  %v495_v54 = vmul.f32 0.01, %v475_v44  ;;  %vm487_vm6 = vcmp.gt.f32.partialorder %v475_v44, 0.0  ;;  %v931_v38 = vld [vmem:[%s1365_s6] ss:$0 sm:$0xff] }
 0x116   : > { %v1001_v45 = vpop.f32.mrf.mxu0  ;;  %v505_v46 = vpack.c.bf16 %v498_v43, %v497_v42 }
 0x117   : > { %v478_v48 = vadd.f32 %v1001_v45, %v909_v26  ;;  %v493_v51 = vmul.f32 0.01, %v467_v41  ;;  %vm485_vm5 = vcmp.gt.f32.partialorder %v467_v41, 0.0  ;;  %v503_v60 = vsel %vm487_vm6, %v475_v44, %v495_v54 }
 0x118   : > { %v469_v50 = vpop.f32.mrf.mxu0  ;;  %1018 = vmatprep.mubr.bf16.mxu1 %v505_v46 }
 0x119   : > { %vm488_vm4 = vcmp.gt.f32.partialorder %v478_v48, 0.0  ;;  %v496_v52 = vmul.f32 0.01, %v478_v48  ;;  %v470_v53 = vadd.f32 %v909_v26, %v469_v50  ;;  %1019 = vmatmul.mubr.bf16.vlgmr.msra.gmra.mxu1 %v506_v49  ;;  %v501_v57 = vsel %vm485_vm5, %v467_v41, %v493_v51 }
 0x11a   : > { %1058 = vmatpush3.bf16.msra.mxu1 %v1117_v20 }
 0x11b   : > { %vm486_vm7 = vcmp.gt.f32.partialorder %v470_v53, 0.0  ;;  %v494_v55 = vmul.f32 0.01, %v470_v53  ;;  %1051 = vmatprep.subr.bf16.mxu1 %v1311_v21  ;;  %v504_v56 = vsel %vm488_vm4, %v478_v48, %v496_v52 }
 0x11c   : > { %v508_v61 = vpack.c.bf16 %v504_v56, %v503_v60 }
 0x11d   : > { %v502_v58 = vsel %vm486_vm7, %v470_v53, %v494_v55 }
 0x11e   : > { %v507_v59 = vpack.c.bf16 %v502_v58, %v501_v57  ;;  %1059 = vmatpush3.bf16.msra.mxu1 %v1311_v21 }
 0x11f   : > { %1052 = vmatprep.subr.bf16.mxu1 %v1119_v22 }
 0x120   : > { %1022 = vmatprep.mubr.bf16.mxu1 %v507_v59 }
 0x121   : > { %1023 = vmatmul.mubr.bf16.gmra.mxu1 %v508_v61 }
 0x122   : > { %1060 = vmatpush3.bf16.msra.mxu1 %v1119_v22 }
 0x123   : > { %1053 = vmatprep.subr.bf16.mxu1 %v1120_v23 }
 0x126   : > { %1061 = vmatpush3.bf16.msra.mxu1 %v1120_v23 }
 0x127   : > { %1054 = vmatprep.subr.bf16.mxu1 %v1121_v24 }
 0x12a   : > { %1062 = vmatpush3.bf16.msra.mxu1 %v1121_v24 }
 0x12b   : > { %1055 = vmatprep.subr.bf16.mxu1 %v1122_v62 }
 0x12e   : > { %1063 = vmatpush3.bf16.msra.mxu1 %v1122_v62 }
 0x12f   : > { %1056 = vmatprep.subr.bf16.mxu1 %v1123_v63 }
 0x132   : > { %1064 = vmatpush3.bf16.msra.mxu1 %v1123_v63 }
 0x133   : > { %1057 = vmatprep.subr.bf16.mxu1 %v1124_v0 }
 0x136   : > { %1065 = vmatpush3.bf16.msra.mxu1 %v1124_v0 }
 0x1d9   : > { %v1020_v1 = vpop.f32.mrf.mxu1 }
 0x1da   : > { %v623_v5 = vadd.f32 %v1020_v1, %v922_v2 }
 0x1db   : > { %v614_v3 = vpop.f32.mrf.mxu1 }
 0x1dc   : > { %v615_v4 = vadd.f32 %v922_v2, %v614_v3  ;;  %v655_v12 = vmul.f32 0.01, %v623_v5  ;;  %vm647_vm10 = vcmp.gt.f32.partialorder %v623_v5, 0.0 }
 0x1dd   : > { %v1021_v6 = vpop.f32.mrf.mxu1 }
 0x1de   : > { %v626_v7 = vadd.f32 %v1021_v6, %v922_v2  ;;  %v653_v9 = vmul.f32 0.01, %v615_v4  ;;  %vm645_vm9 = vcmp.gt.f32.partialorder %v615_v4, 0.0  ;;  %v663_v20 = vsel %vm647_vm10, %v623_v5, %v655_v12 }
 0x1df   : > { %v617_v8 = vpop.f32.mrf.mxu1 }
 0x1e0   : > { %vm648_vm8 = vcmp.gt.f32.partialorder %v626_v7, 0.0  ;;  %v656_v10 = vmul.f32 0.01, %v626_v7  ;;  %v618_v11 = vadd.f32 %v922_v2, %v617_v8  ;;  %v661_v18 = vsel %vm645_vm9, %v615_v4, %v653_v9 }
 0x1e1   : > { %v1024_v13 = vpop.f32.mrf.mxu1 }
 0x1e2   : > { %vm646_vm11 = vcmp.gt.f32.partialorder %v618_v11, 0.0  ;;  %v654_v14 = vmul.f32 0.01, %v618_v11  ;;  %v664_v15 = vsel %vm648_vm8, %v626_v7, %v656_v10  ;;  %v639_v21 = vadd.f32 %v1024_v13, %v922_v2 }
 0x1e3   : > { %v630_v16 = vpop.f32.mrf.mxu1  ;;  %v670_v24 = vpack.c.bf16 %v664_v15, %v663_v20 }
 0x1e4   : > { %v631_v17 = vadd.f32 %v922_v2, %v630_v16  ;;  %v662_v19 = vsel %vm646_vm11, %v618_v11, %v654_v14  ;;  %v659_v30 = vmul.f32 0.01, %v639_v21  ;;  %vm651_vm14 = vcmp.gt.f32.partialorder %v639_v21, 0.0 }
 0x1e5   : > { %v1025_v22 = vpop.f32.mrf.mxu1  ;;  %v669_v23 = vpack.c.bf16 %v662_v19, %v661_v18 }
 0x1e6   : > { %v642_v25 = vadd.f32 %v1025_v22, %v922_v2  ;;  %v657_v27 = vmul.f32 0.01, %v631_v17  ;;  %vm649_vm13 = vcmp.gt.f32.partialorder %v631_v17, 0.0  ;;  %v667_v35 = vsel %vm651_vm14, %v639_v21, %v659_v30 }
 0x1e7   : > { %v633_v26 = vpop.f32.mrf.mxu1  ;;  %1042 = vmatprep.mubr.bf16.mxu0 %v669_v23 }
 0x1e8   : > { %vm652_vm12 = vcmp.gt.f32.partialorder %v642_v25, 0.0  ;;  %v660_v28 = vmul.f32 0.01, %v642_v25  ;;  %v634_v29 = vadd.f32 %v922_v2, %v633_v26  ;;  %1043 = vmatmul.mubr.bf16.vlgmr.msra.gmra.mxu0 %v670_v24  ;;  %v665_v33 = vsel %vm649_vm13, %v631_v17, %v657_v27 }
 0x1ea   : > { %vm650_vm15 = vcmp.gt.f32.partialorder %v634_v29, 0.0  ;;  %v658_v31 = vmul.f32 0.01, %v634_v29  ;;  %v668_v32 = vsel %vm652_vm12, %v642_v25, %v660_v28 }
 0x1eb   : > { %v672_v37 = vpack.c.bf16 %v668_v32, %v667_v35 }
 0x1ec   : > { %v666_v34 = vsel %vm650_vm15, %v634_v29, %v658_v31 }
 0x1ed   : > { %v671_v36 = vpack.c.bf16 %v666_v34, %v665_v33 }
 0x1ef   : > { %1046 = vmatprep.mubr.bf16.mxu1 %v671_v36 }
 0x1f0   : > { %1047 = vmatmul.mubr.bf16.vlgmr.msra.gmra.mxu1 %v672_v37 }
 0x2a8   : > { %v1044_v39 = vpop.f32.mrf.mxu0 }
 0x2a9   : > { %v787_v40 = vadd.f32 %v1044_v39, %v931_v38 }
 0x2aa   : > { %v778_v41 = vpop.f32.mrf.mxu0 }
 0x2ab   : > { %812 = vst.msk [vmem:[%s310_s28 + $0x10] sm:$0xff] %vm809_vm0, %v787_v40  ;;  %v779_v42 = vadd.f32 %v931_v38, %v778_v41 }
 0x2ac   : > { %v1045_v43 = vpop.f32.mrf.mxu0 }
 0x2ad   : > { %810 = vst.msk [vmem:[%s310_s28] sm:$0xff] %vm809_vm0, %v779_v42  ;;  %v790_v44 = vadd.f32 %v1045_v43, %v931_v38 }
 0x2ae   : > { %v781_v45 = vpop.f32.mrf.mxu0 }
 0x2af   : > { %813 = vst.msk [vmem:[%s310_s28 + $0x18] sm:$0xff] %vm809_vm0, %v790_v44  ;;  %v782_v46 = vadd.f32 %v931_v38, %v781_v45 }
 0x2b0   : > { %v1048_v47 = vpop.f32.mrf.mxu1 }
 0x2b1   : > { %811 = vst.msk [vmem:[%s310_s28 + $0x8] sm:$0xff] %vm809_vm0, %v782_v46  ;;  %v803_v48 = vadd.f32 %v1048_v47, %v931_v38 }
 0x2b2   : > { %v794_v49 = vpop.f32.mrf.mxu1 }
 0x2b3   : > { %816 = vst.msk [vmem:[%s310_s28 + $0x30] sm:$0xff] %vm809_vm0, %v803_v48  ;;  %v795_v50 = vadd.f32 %v931_v38, %v794_v49 }
 0x2b4   : > { %v1049_v51 = vpop.f32.mrf.mxu1 }
 0x2b5   : > { %814 = vst.msk [vmem:[%s310_s28 + $0x20] sm:$0xff] %vm809_vm0, %v795_v50  ;;  %v806_v52 = vadd.f32 %v1049_v51, %v931_v38 }
 0x2b6   : > { %v797_v53 = vpop.f32.mrf.mxu1 }
 0x2b7   : > { %817 = vst.msk [vmem:[%s310_s28 + $0x38] sm:$0xff] %vm809_vm0, %v806_v52  ;;  %v798_v54 = vadd.f32 %v931_v38, %v797_v53 }
 0x2b9   : > { %815 = vst.msk [vmem:[%s310_s28 + $0x28] sm:$0xff] %vm809_vm0, %v798_v54 }
 0x2ba PF: > { %s19_s24 = sadd.s32 1, %s1191_s24  }
 0x2bb   : > { %p16_p2 = scmp.ge.s32.totalorder %s19_s24, 4  }
 0x2bd   :  { %18 = sbr.rel (!%p16_p2) target bundleno = 2 (0x2), region = 87 }
 0x2c2   :  { %840 = vsyncpa [#allocation3], 1 }
 0x2c3   :  { %842 = vsyncpa [#allocation3 + $0x1], 1 }
 0x2c4   :  { %843 = vsyncpa [#allocation5], 1 }

</bundles_post_ra>
